<compile_context>
chip_gen: v7x
topology: tpu7x:2x2x1
jax: 0.10.0
libtpu: 0.0.40
codegen_flags: <defaults>
</compile_context>

<pallas_src>
import functools

import jax
import jax.numpy as jnp
from jax.experimental import pallas as pl
from jax.experimental.pallas import tpu as pltpu


# --------------------------------------------------------------------------
# Fast path: whole graph fits in one VMEM tile (the common SimGNN case).
# --------------------------------------------------------------------------
def _attention_kernel_fused(x_ref, w2_ref, h_ref, *, n_nodes):
    x = x_ref[...]
    if x.dtype != jnp.float32:
        x = x.astype(jnp.float32)
    w2 = w2_ref[...]
    if w2.dtype != jnp.float32:
        w2 = w2.astype(jnp.float32)

    mean_x = jnp.sum(x, axis=0, keepdims=True) * (1.0 / n_nodes)       # (1, D)
    # Tiny (1,D)@(D,D); MXU is otherwise idle in this kernel.
    c = jnp.tanh(jnp.dot(mean_x, w2, preferred_element_type=jnp.float32))
    scores = jax.nn.sigmoid(jnp.sum(x * c, axis=1, keepdims=True))     # (N, 1)
    h_ref[...] = jnp.sum(scores * x, axis=0, keepdims=True)            # (1, D)


# --------------------------------------------------------------------------
# Streaming path: N tiled over the grid, 2-phase accumulation.
# --------------------------------------------------------------------------
def _attention_kernel_streamed(x_ref, w2_ref, h_ref, c_sc, *,
                               n_nodes, tile_n, needs_mask):
    phase = pl.program_id(0)          # 0: build graph context c, 1: build h
    i = pl.program_id(1)              # node-tile index
    last = pl.num_programs(1) - 1

    x = x_ref[...]
    if x.dtype != jnp.float32:        # bf16 storage -> f32 compute (v5e-safe)
        x = x.astype(jnp.float32)

    if needs_mask:
        # Rows past N in the final partial tile hold undefined VMEM data;
        # select (not multiply) so stray NaN/Inf cannot leak into reductions.
        row = jax.lax.broadcasted_iota(jnp.int32, (tile_n, 1), 0) + i * tile_n
        valid = row < n_nodes
        x_sum = jnp.where(valid, x, 0.0)
    else:
        valid = None
        x_sum = x

    # ---- phase 0: accumulate sum_n x[n,:]; finalize c = tanh(mean(x) @ W2) --
    @pl.when(phase == 0)
    def _():
        @pl.when(i == 0)
        def _():
            c_sc[...] = jnp.zeros_like(c_sc)

        c_sc[...] += jnp.sum(x_sum, axis=0, keepdims=True)             # (1, D)

        @pl.when(i == last)
        def _():
            mean_x = c_sc[...] * (1.0 / n_nodes)                       # (1, D)
            w2 = w2_ref[...]
            if w2.dtype != jnp.float32:
                w2 = w2.astype(jnp.float32)
            c_sc[...] = jnp.tanh(
                jnp.dot(mean_x, w2, preferred_element_type=jnp.float32))

    # ---- phase 1: h = sum_n sigmoid(x[n,:] . c) * x[n,:] --------------------
    @pl.when(phase == 1)
    def _():
        c = c_sc[...]                                                  # (1, D)
        scores = jax.nn.sigmoid(
            jnp.sum(x * c, axis=1, keepdims=True))                     # (tile_n, 1)
        if needs_mask:
            scores = jnp.where(valid, scores, 0.0)
        part = jnp.sum(scores * x_sum, axis=0, keepdims=True)          # (1, D)

        @pl.when(i == 0)
        def _():
            h_ref[...] = part

        @pl.when(i != 0)
        def _():
            h_ref[...] += part


def attention_module(x, w2, *, tile_n=None, max_fused_rows=2048):
    """SimGNN attention readout.  x: (N, D), w2: (D, D) -> h: (1, D) float32.

    x / w2 may be float32 or bfloat16 (bf16 halves HBM traffic on v6e/v7x);
    compute and the returned h are always float32.
    """
    n, d = x.shape
    assert w2.shape == (d, d)

    itemsize = jnp.dtype(x.dtype).itemsize
    cost = pl.CostEstimate(
        flops=2 * d * d + 6 * n * d,
        transcendentals=n + d,
        bytes_accessed=n * d * itemsize
        + d * d * jnp.dtype(w2.dtype).itemsize
        + d * 4,
    )

    # ---- fast path: single fused invocation, x resident in VMEM -------------
    if tile_n is None and n <= max_fused_rows:
        return pl.pallas_call(
            functools.partial(_attention_kernel_fused, n_nodes=n),
            out_shape=jax.ShapeDtypeStruct((1, d), jnp.float32),
            grid=(1,),
            in_specs=[
                pl.BlockSpec((n, d), lambda i: (0, 0)),   # x, whole array
                pl.BlockSpec((d, d), lambda i: (0, 0)),   # W2, whole array
            ],
            out_specs=pl.BlockSpec((1, d), lambda i: (0, 0)),
            compiler_params=pltpu.CompilerParams(
                dimension_semantics=("arbitrary",)),
            cost_estimate=cost,
        )(x, w2)

    # ---- streaming path: node-tiled grid, 2-phase accumulation --------------
    # Node-tile size: sublane-aligned; capped so double-buffered x tiles plus
    # W2 and scratch stay tiny next to the scoped-VMEM limit on all chips
    # (incl. v7x's 32 MiB scoped / 64 MiB physical VMEM).
    if tile_n is None:
        tile_n = 512
    tile_n = max(8, min(tile_n, ((n + 7) // 8) * 8))
    tile_n = ((tile_n + 7) // 8) * 8
    n_tiles = pl.cdiv(n, tile_n)
    needs_mask = (n % tile_n) != 0

    kernel = functools.partial(
        _attention_kernel_streamed, n_nodes=n, tile_n=tile_n,
        needs_mask=needs_mask)

    return pl.pallas_call(
        kernel,
        out_shape=jax.ShapeDtypeStruct((1, d), jnp.float32),
        grid_spec=pltpu.PrefetchScalarGridSpec(
            num_scalar_prefetch=0,
            # (phase, node-tile); phase is the outer axis so c is fully formed
            # before any h accumulation begins.
            grid=(2, n_tiles),
            in_specs=[
                pl.BlockSpec((tile_n, d), lambda p, i: (i, 0)),  # x, streamed
                pl.BlockSpec((d, d), lambda p, i: (0, 0)),       # W2, resident
            ],
            out_specs=pl.BlockSpec((1, d), lambda p, i: (0, 0)),  # h, resident
            scratch_shapes=[pltpu.VMEM((1, d), jnp.float32)],      # sum(x) -> c
        ),
        compiler_params=pltpu.CompilerParams(
            dimension_semantics=("arbitrary", "arbitrary")),
        cost_estimate=cost,
    )(x, w2)


def _reference(x, w2):
    # Pure-JAX mirror of the PyTorch forward.
    c = jnp.tanh(jnp.mean(x @ w2, axis=0)).reshape(1, -1)
    h = (x.T @ jax.nn.sigmoid(x @ c.T)).T
    return h


if __name__ == "__main__":
    # SimGNN config: D = filters_3 = 16; small graph with N = 8 nodes.
    N, D = 8, 16
    key = jax.random.PRNGKey(0)
    kx, kw = jax.random.split(key)

    # Node embeddings (output of the GCN stack in the real model).
    x = jax.random.normal(kx, (N, D), dtype=jnp.float32)
    # Deterministic Xavier-uniform init for W2, matching nn.init.xavier_uniform_.
    bound = (6.0 / (D + D)) ** 0.5
    w2 = jax.random.uniform(kw, (D, D), minval=-bound, maxval=bound,
                            dtype=jnp.float32)

    # Fast fused path.
    h = jax.block_until_ready(attention_module(x, w2))
    h_ref = _reference(x, w2)
    assert h.shape == (1, D)
    assert jnp.allclose(h, h_ref, atol=1e-5, rtol=1e-5), (h, h_ref)

    # bf16 storage path (v6e/v7x HBM-bandwidth optimization); compute stays f32.
    h_bf16 = jax.block_until_ready(
        attention_module(x.astype(jnp.bfloat16), w2.astype(jnp.bfloat16)))
    assert jnp.allclose(h_bf16, h_ref, atol=1e-1, rtol=1e-1), (h_bf16, h_ref)

    # Larger ragged graph exercising the multi-tile streaming + mask path.
    N2 = 37
    x2 = jax.random.normal(jax.random.PRNGKey(2), (N2, D), dtype=jnp.float32)
    h2 = jax.block_until_ready(attention_module(x2, w2, tile_n=16))
    assert jnp.allclose(h2, _reference(x2, w2), atol=1e-4, rtol=1e-4)

    # Exact multi-tile case (no mask code emitted).
    N3 = 64
    x3 = jax.random.normal(jax.random.PRNGKey(3), (N3, D), dtype=jnp.float32)
    h3 = jax.block_until_ready(attention_module(x3, w2, tile_n=16))
    assert jnp.allclose(h3, _reference(x3, w2), atol=1e-4, rtol=1e-4)

    print("KERNEL_OK")
</pallas_src>

<mosaic_0001>
module attributes {stable_mosaic.version = 11 : i64} {
  func.func @_attention_kernel_fused(%arg0: i32, %arg1: memref<8x16xf32, #tpu.memory_space<vmem>>, %arg2: memref<16x16xf32, #tpu.memory_space<vmem>>, %arg3: memref<1x16xf32, #tpu.memory_space<vmem>>) attributes {dimension_semantics = [#tpu.dimension_semantics<arbitrary>], iteration_bounds = array<i64: 1>, scalar_prefetch = 0 : i64, scratch_operands = 0 : i64, tpu.core_type = #tpu.core_type<tc>, window_params = [{pipeline_mode = #tpu.pipeline_mode<synchronous>, transform_indices = @transform_0, window_bounds = array<i64: 8, 16>}, {pipeline_mode = #tpu.pipeline_mode<synchronous>, transform_indices = @transform_1, window_bounds = array<i64: 16, 16>}, {pipeline_mode = #tpu.pipeline_mode<synchronous>, transform_indices = @transform_2, window_bounds = array<i64: 1, 16>}]} {
    %c0 = arith.constant 0 : index
    %c0_0 = arith.constant 0 : index
    %0 = vector.load %arg1[%c0, %c0_0] : memref<8x16xf32, #tpu.memory_space<vmem>>, vector<8x16xf32>
    %c0_1 = arith.constant 0 : index
    %c0_2 = arith.constant 0 : index
    %1 = vector.load %arg2[%c0_1, %c0_2] : memref<16x16xf32, #tpu.memory_space<vmem>>, vector<16x16xf32>
    %cst = arith.constant dense<0.000000e+00> : vector<16xf32>
    %2 = vector.multi_reduction <add>, %0, %cst [0] : vector<8x16xf32> to vector<16xf32>
    %3 = vector.shape_cast %2 : vector<16xf32> to vector<1x16xf32>
    %cst_3 = arith.constant 1.250000e-01 : f32
    %4 = vector.broadcast %cst_3 : f32 to vector<1x16xf32>
    %5 = arith.mulf %3, %4 : vector<1x16xf32>
    %cst_4 = arith.constant dense<0.000000e+00> : vector<1x16xf32>
    %6 = tpu.matmul %5, %1, %cst_4 {dimension_numbers = #tpu.dot_dimension_numbers<[1], [0], [0], [1], [0, 0, 1, 1], [], []>} : vector<1x16xf32>, vector<16x16xf32>, vector<1x16xf32> -> vector<1x16xf32>
    %7 = math.tanh %6 : vector<1x16xf32>
    %8 = vector.broadcast %7 : vector<1x16xf32> to vector<8x16xf32>
    %9 = arith.mulf %0, %8 : vector<8x16xf32>
    %cst_5 = arith.constant dense<0.000000e+00> : vector<8xf32>
    %10 = vector.multi_reduction <add>, %9, %cst_5 [1] : vector<8x16xf32> to vector<8xf32>
    %11 = vector.shape_cast %10 : vector<8xf32> to vector<8x1xf32>
    %12 = arith.negf %11 : vector<8x1xf32>
    %13 = math.exp %12 : vector<8x1xf32>
    %cst_6 = arith.constant 1.000000e+00 : f32
    %14 = vector.broadcast %cst_6 : f32 to vector<8x1xf32>
    %15 = arith.addf %14, %13 : vector<8x1xf32>
    %16 = arith.divf %14, %15 : vector<8x1xf32>
    %17 = vector.broadcast %16 : vector<8x1xf32> to vector<8x16xf32>
    %18 = arith.mulf %17, %0 : vector<8x16xf32>
    %cst_7 = arith.constant dense<0.000000e+00> : vector<16xf32>
    %19 = vector.multi_reduction <add>, %18, %cst_7 [0] : vector<8x16xf32> to vector<16xf32>
    %20 = vector.shape_cast %19 : vector<16xf32> to vector<1x16xf32>
    %c0_8 = arith.constant 0 : index
    %c0_9 = arith.constant 0 : index
    %21 = vector.load %arg3[%c0_8, %c0_9] : memref<1x16xf32, #tpu.memory_space<vmem>>, vector<1x16xf32>
    tpu.vector_store %arg3[%c0_8, %c0_9], %20 {strides = array<i32>} : memref<1x16xf32, #tpu.memory_space<vmem>>, vector<1x16xf32>,
    return
  }
  func.func @transform_0(%arg0: i32) -> (i32, i32) {
    %c0_i32 = arith.constant 0 : i32
    %c0_i32_0 = arith.constant 0 : i32
    %c0_i32_1 = arith.constant 0 : i32
    return %c0_i32, %c0_i32_0 : i32, i32
  }
  func.func @transform_1(%arg0: i32) -> (i32, i32) {
    %c0_i32 = arith.constant 0 : i32
    %c0_i32_0 = arith.constant 0 : i32
    %c0_i32_1 = arith.constant 0 : i32
    return %c0_i32, %c0_i32_0 : i32, i32
  }
  func.func @transform_2(%arg0: i32) -> (i32, i32) {
    %c0_i32 = arith.constant 0 : i32
    %c0_i32_0 = arith.constant 0 : i32
    %c0_i32_1 = arith.constant 0 : i32
    return %c0_i32, %c0_i32_0 : i32, i32
  }
}

</mosaic_0001>

<bundles_post_ra>
// kernel: tpu_custom_call.1
= control target key start
LH: loop header
LB: loop body
LE: loop exit
PB: predicated region body
PF: predicated region fallthrough
CT: control target
= control target key end

     0   :  { %7 = vsyncpa [#allocation3], 0  ;;  %s335_s0 = inlined_call_operand.hbm [shape: f32[8,16], index: 0, kind: input, shape index: {}]   ;;  %s336_s1 = inlined_call_operand.hbm [shape: f32[16,16], index: 1, kind: input, shape index: {}]   ;;  %s337_s2 = inlined_call_operand.hbm [shape: f32[1,16], index: 2, kind: output, shape index: {}]  }
   0x1   :  { %8 = vsyncpa [#allocation6], 0 }
   0x2   :  { %9 = vsyncpa [#allocation4], 0  ;;  %s265_s9 = smov [#allocation2]   ;;  %s266_s11 = smov [#allocation5]  }
   0x3   :  { %s16_s10 = sshll.u32 %s265_s9, 4  ;;  %s25_s12 = sshll.u32 %s266_s11, 4  ;;  %s17_s10 = int_to_ptr.vmem [resolvable:$true] %s16_s10  ;;  %s288_s12 = int_to_ptr.vmem [resolvable:$true] %s25_s12 }
   0x4   :  { %s193_s15 = scalar_lea.hbm %s335_s0, 128 }
   0x5   :  { %p194_p0 = scmp.ne.s32.totalorder %s335_s0, %s193_s15  ;;  %p197_p1 = scmp.lt.u32.totalorder %s193_s15, %s335_s0 }
   0x7   :  { %p199_p2 = pnand %p197_p1, %p194_p0 }
   0x9   :  { %202 = shalt.err (!%p199_p2)
}
   0xa   :  { %s203_s20 = scalar_lea.vmem %s17_s10, 128  ;;  %p208_p4 = scmp.lt.s32.totalorder %s17_s10, %s17_s10 }
   0xb   :  { %p204_p3 = scmp.ne.s32.totalorder %s17_s10, %s203_s20  ;;  %p209_p5 = scmp.lt.s32.totalorder %s203_s20, %s203_s20 }
   0xd   :  { %p210_p6 = por %p209_p5, %p208_p4 }
   0xf   :  { %p211_p7 = pnand %p210_p6, %p204_p3 }
  0x11   :  { %214 = shalt.err (!%p211_p7)
}
  0x12   :  { %19 = dma.hbm_to_vmem [thread:$0]  %s335_s0, 128, %s17_s10, [#allocation3]  }
  0x13   :  { %s215_s25 = scalar_lea.hbm %s336_s1, 256 }
  0x14   :  { %p216_p8 = scmp.ne.s32.totalorder %s336_s1, %s215_s25  ;;  %p219_p9 = scmp.lt.u32.totalorder %s215_s25, %s336_s1 }
  0x16   :  { %p221_p10 = pnand %p219_p9, %p216_p8 }
  0x18   :  { %224 = shalt.err (!%p221_p10)
}
  0x19   :  { %s225_s30 = scalar_lea.vmem %s288_s12, 256  ;;  %p230_p12 = scmp.lt.s32.totalorder %s288_s12, %s288_s12 }
  0x1a   :  { %p226_p11 = scmp.ne.s32.totalorder %s288_s12, %s225_s30  ;;  %p231_p13 = scmp.lt.s32.totalorder %s225_s30, %s225_s30 }
  0x1c   :  { %p232_p0 = por %p231_p13, %p230_p12 }
  0x1e   :  { %p233_p1 = pnand %p232_p0, %p226_p11 }
  0x20   :  { %236 = shalt.err (!%p233_p1)
}
  0x21   :  { %s267_s0 = smov 128   ;;  %s268_s3 = smov 8  }
  0x22   :  { %31 = dma.hbm_to_vmem [thread:$0]  %s336_s1, 256, %s288_s12, [#allocation6], %s267_s0, %s267_s0, %s268_s3  }
  0x23   :  { %259 = dma.done.wait [#allocation3], 128  }
  0x24   :  { %260 = vsyncadd [#allocation3], 4294967168 }
  0x25   :  { %261 = dma.done.wait [#allocation6], 256  }
  0x26   :  { %262 = vsyncadd [#allocation6], 4294967040  ;;  %v269_v0 = vmov 0.0|0.0   ;;  %vm270_vm0 = vmmov 0   ;;  %v271_v1 = vmov 0.0   ;;  %vm41_vm1 = vcmask 130048  }
  0x27   :  { %176 = vmatprep.subr.bf16.mxu0 %v269_v0  ;;  %173 = vmatprep.mubr.msk.f32.mxu0 %vm270_vm0, %v271_v1  ;;  %v39_v2 = vld [vmem:[#allocation5] sm:$0xff]  ;;  %v40_v3 = vld [vmem:[#allocation5 + $0x8] sm:$0xff]  ;;  %v38_v4 = vld [vmem:[#allocation2] sm:$0xff]  ;;  %v124_v15 = vlaneseq  ;;  %s272_s1 = smov [#allocation7]   ;;  %vm146_vm2 = vcmask 122880  }
  0x28   :  { %v177_v5 = vpack.c.bf16 %v40_v3, %v39_v2  ;;  %v42_v6 = vsel %vm41_vm1, %v38_v4, 0.0  ;;  %s154_s6 = sshll.u32 %s272_s1, 4  ;;  %s155_s6 = int_to_ptr.vmem [resolvable:$true] %s154_s6 }
  0x29   :  { %v43_v7 = vrot.slane %v42_v6, 4  ;;  %v125_v17 = vshrl.u32 %v124_v15, 7  ;;  %s237_s7 = scalar_lea.vmem %s155_s6, 16  ;;  %s241_s8 = scalar_lea.vmem %s155_s6, 32 }
  0x2a   :  { %178 = vmatpush3.bf16.msra.mxu0 %v177_v5  ;;  %p238_p2 = scmp.ne.s32.totalorder %s155_s6, %s237_s7  ;;  %p242_p3 = scmp.lt.s32.totalorder %s155_s6, %s155_s6 }
  0x2b   :  { %v44_v8 = vadd.f32 %v43_v7, %v42_v6  ;;  %v126_v18 = vsub.s32 0, %v125_v17  ;;  %p243_p4 = scmp.lt.s32.totalorder %s241_s8, %s237_s7 }
  0x2d   :  { %v45_v9 = vrot.slane %v44_v8, 2  ;;  %p244_p5 = por %p243_p4, %p242_p3 }
  0x2f   :  { %v46_v10 = vadd.f32 %v45_v9, %v44_v8  ;;  %p245_p6 = pnand %p244_p5, %p238_p2 }
  0x31   :  { %v47_v11 = vrot.slane %v46_v10, 1 }
  0x33   :  { %v48_v12 = vadd.f32 %v47_v11, %v46_v10 }
  0x35   :  { %v49_v13 = vmul.f32 0.125, %v48_v12 }
  0x37   :  { %174 = vmatmul.mubr.msk.f32.vlgmr.msra.gmra.mrb[0].mxu0 %vm41_vm1, %v49_v13 }
 0x10a   :  { %v119_v14 = vpop.f32.mrb[0].mxu0 }
 0x10b   :  { %187 = vtanh.f32 %v119_v14  ;;  %v175_v16 = vpop.f32.mrb[1].mxu0 }
 0x115   :  { %v188_v19 = vpop.eup %187 }
 0x116   :  { %v127_v20 = vrot.slane %v188_v19, %v126_v18 }
 0x118   :  { %v128_v21 = vmul.f32 %v127_v20, %v38_v4 }
 0x11a   :  { %v129_v22 = vsel %vm41_vm1, %v128_v21, 0.0 }
 0x11b   :  { %130 = vadd.xlane.f32.xlu0 %v129_v22 }
 0x1a8   :  { %v131_v23 = vpop.xlane.xlu0 %130 }
 0x1a9   :  { %v165_v24 = vmul.f32 -1.442695, %v131_v23 }
 0x1ab   :  { %189 = vpow2.f32 %v165_v24 }
 0x1b5   :  { %v190_v25 = vpop.eup %189 }
 0x1b6   :  { %v135_v26 = vadd.f32 1.0, %v190_v25 }
 0x1b8   :  { %191 = vrcp.f32 %v135_v26 }
 0x1c2   :  { %v192_v27 = vpop.eup %191 }
 0x1c3   :  { %v138_v28 = vmul.f32 %v192_v27, %v38_v4 }
 0x1c5   :  { %v139_v29 = vsel %vm41_vm1, %v138_v28, 0.0 }
 0x1c6   :  { %v140_v30 = vrot.slane %v139_v29, 4 }
 0x1c8   :  { %v141_v31 = vadd.f32 %v140_v30, %v139_v29 }
 0x1ca   :  { %v142_v32 = vrot.slane %v141_v31, 2 }
 0x1cc   :  { %v143_v33 = vadd.f32 %v142_v32, %v141_v31 }
 0x1ce   :  { %v144_v34 = vrot.slane %v143_v33, 1 }
 0x1d0   :  { %v145_v35 = vadd.f32 %v144_v34, %v143_v33 }
 0x1d2   :  { %147 = vst.msk [vmem:[#allocation7] sm:$0x1] %vm146_vm2, %v145_v35 }
 0x1d3   :  { %248 = shalt.err (!%p245_p6)
}
 0x1d4   :  { %s249_s11 = scalar_lea.hbm %s337_s2, 16 }
 0x1d5   :  { %p250_p7 = scmp.ne.s32.totalorder %s337_s2, %s249_s11  ;;  %p253_p8 = scmp.lt.u32.totalorder %s249_s11, %s337_s2 }
 0x1d7   :  { %p255_p9 = pnand %p253_p8, %p250_p7 }
 0x1d9   :  { %258 = shalt.err (!%p255_p9)
}
 0x1da   :  { %157 = dma.vmem_to_hbm [thread:$0]  %s155_s6, 16, %s337_s2, [#allocation4]  }
 0x1db   :  { %263 = dma.done.wait [#allocation4], 16  }
 0x1dc   :  { %264 = vsyncadd [#allocation4], 4294967280 }
 0x1dd   :  { %161 = vsyncpa [#allocation3], 1 }
 0x1de   :  { %162 = vsyncpa [#allocation6], 1 }
 0x1df   :  { %163 = vsyncpa [#allocation4], 1 }

</bundles_post_ra>
